<compile_context>
chip_gen: v5e
topology: v5e:2x2
jax: 0.10.0
libtpu: 0.0.40
codegen_flags: <defaults>
</compile_context>

<pallas_src>
import jax
import jax.numpy as jnp
from jax.experimental import pallas as pl
from jax.experimental.pallas import tpu as pltpu


NEG_SLOPE = 0.2  # matches nn.LeakyReLU(negative_slope=0.2)


def _leaky_relu(v):
    return jnp.where(v > 0, v, NEG_SLOPE * v)


def _round_up(x, m):
    return ((x + m - 1) // m) * m


def _mlp_body(x_ref, w1_ref, b1_ref, w2_ref, b2_ref, w3_ref, b3_ref, w4_ref, b4_ref):
    # x block streams as f32; cast to bf16 in-kernel (MXU operands), f32 accumulate.
    x = x_ref[...].astype(jnp.bfloat16)

    # l1 + LeakyReLU   (dropout in eval mode == identity)
    h = jnp.dot(x, w1_ref[...], preferred_element_type=jnp.float32) + b1_ref[...]
    h = _leaky_relu(h)

    # l2 + LeakyReLU
    h = jnp.dot(h.astype(jnp.bfloat16), w2_ref[...],
                preferred_element_type=jnp.float32) + b2_ref[...]
    h = _leaky_relu(h)

    # l3 -> feat
    feat = jnp.dot(h.astype(jnp.bfloat16), w3_ref[...],
                   preferred_element_type=jnp.float32) + b3_ref[...]

    # LeakyReLU + (dropout identity) + l4  (out columns padded to 128 lanes)
    h = _leaky_relu(feat)
    out = jnp.dot(h.astype(jnp.bfloat16), w4_ref[...],
                  preferred_element_type=jnp.float32) + b4_ref[...]
    return out, feat


def mlp_kernel_out_only(x_ref, w1_ref, b1_ref, w2_ref, b2_ref,
                        w3_ref, b3_ref, w4_ref, b4_ref, out_ref):
    out, _ = _mlp_body(x_ref, w1_ref, b1_ref, w2_ref, b2_ref,
                       w3_ref, b3_ref, w4_ref, b4_ref)
    out_ref[...] = out.astype(out_ref.dtype)


def mlp_kernel_with_feat(x_ref, w1_ref, b1_ref, w2_ref, b2_ref,
                         w3_ref, b3_ref, w4_ref, b4_ref, out_ref, feat_ref):
    out, feat = _mlp_body(x_ref, w1_ref, b1_ref, w2_ref, b2_ref,
                          w3_ref, b3_ref, w4_ref, b4_ref)
    out_ref[...] = out.astype(out_ref.dtype)
    feat_ref[...] = feat.astype(feat_ref.dtype)


def _resident_spec(shape):
    # Constant-index blocks never re-DMA across the grid; single-buffer them to
    # halve their VMEM footprint.  Fallback for older BlockSpec signatures.
    try:
        return pl.BlockSpec(shape, lambda i: (0, 0),
                            pipeline_mode=pl.Buffered(buffer_count=1))
    except TypeError:  # pragma: no cover - older jax without pipeline_mode
        return pl.BlockSpec(shape, lambda i: (0, 0))


def _vmem_estimate(tm, in_dim, hid_dim, out_pad, with_feat):
    f32, bf16 = 4, 2
    x_blk = 2 * tm * in_dim * f32                      # double-buffered input stream
    out_blk = 2 * tm * out_pad * f32
    feat_blk = 2 * tm * hid_dim * f32 if with_feat else 0
    weights = (in_dim * hid_dim + 2 * hid_dim * hid_dim
               + hid_dim * out_pad) * bf16              # single-buffered residents
    biases = (3 * hid_dim + out_pad) * f32
    return x_blk + out_blk + feat_blk + weights + biases


def example_mlp_forward(x, params, return_feats=False, tm=512):
    """x: [B, C, H, W] float32 (NCHW). params: dict of transposed f32 weights/biases.

    tm: requested batch tile (rows per grid step).  The kernel is HBM-bound at
    these shapes, so larger tiles (512-1024) amortize the ~0.35 us per-step
    overhead on all of v5e/v6e/v7x; the MXU chunks M internally.  The effective
    tile is shrunk to the smallest multiple of 8 that covers B with the implied
    number of tiles (bounds zero-row padding waste), and clamped to >= 8.
    """
    B = x.shape[0]
    x2d = x.reshape(B, -1)                       # flatten(1) — free view
    in_dim = x2d.shape[1]
    hid_dim = params["w1"].shape[1]
    out_dim = params["w4"].shape[1]

    # --- batch tiling / bounded padding ----------------------------------------
    tm = max(8, int(tm))
    n_blocks = max(1, -(-B // tm))               # tiles implied by requested tm
    tm_eff = max(8, _round_up(-(-B // n_blocks), 8))
    b_pad = tm_eff * n_blocks
    if b_pad != B:
        x2d = jnp.pad(x2d, ((0, b_pad - B), (0, 0)))

    # --- lane-dense output: pad out_dim to a multiple of 128 (unmasked vst) ----
    out_pad = _round_up(out_dim, 128)
    w4 = params["w4"]
    b4 = params["b4"]
    if out_pad != out_dim:
        w4 = jnp.pad(w4, ((0, 0), (0, out_pad - out_dim)))
        b4 = jnp.pad(b4, ((0, 0), (0, out_pad - out_dim)))

    # --- bf16 weights for the MXU (tiny vs. the activation stream) -------------
    bf16 = jnp.bfloat16
    w1 = params["w1"].astype(bf16)
    w2 = params["w2"].astype(bf16)
    w3 = params["w3"].astype(bf16)
    w4 = w4.astype(bf16)
    b1, b2, b3 = params["b1"], params["b2"], params["b3"]

    # Activation blocks stream (block index follows grid i); weights/biases are
    # constant-index, single-buffered, VMEM-resident across the whole grid.
    act_spec = lambda cols: pl.BlockSpec((tm_eff, cols), lambda i: (i, 0))

    in_specs = [
        act_spec(in_dim),
        _resident_spec((in_dim, hid_dim)), _resident_spec((1, hid_dim)),
        _resident_spec((hid_dim, hid_dim)), _resident_spec((1, hid_dim)),
        _resident_spec((hid_dim, hid_dim)), _resident_spec((1, hid_dim)),
        _resident_spec((hid_dim, out_pad)), _resident_spec((1, out_pad)),
    ]

    # Explicit VMEM budget: v5e scoped default is 16 MiB; cap at 64 MiB (v7x/TC).
    vmem_bytes = _vmem_estimate(tm_eff, in_dim, hid_dim, out_pad, return_feats)
    vmem_limit = int(min(64 * 1024 * 1024,
                         max(32 * 1024 * 1024, int(1.5 * vmem_bytes))))
    cp = pltpu.CompilerParams(
        dimension_semantics=("parallel",),       # megacore-shard batch tiles (v7x)
        vmem_limit_bytes=vmem_limit,
    )

    args = (x2d, w1, b1, w2, b2, w3, b3, w4, b4)

    if return_feats:
        out_p, feat_p = pl.pallas_call(
            mlp_kernel_with_feat,
            out_shape=(
                jax.ShapeDtypeStruct((b_pad, out_pad), jnp.float32),
                jax.ShapeDtypeStruct((b_pad, hid_dim), jnp.float32),
            ),
            grid=(n_blocks,),
            in_specs=in_specs,
            out_specs=(act_spec(out_pad), act_spec(hid_dim)),
            compiler_params=cp,
        )(*args)
        # Only pay an extra copy when padding actually occurred.
        out = out_p if (b_pad == B and out_pad == out_dim) else out_p[:B, :out_dim]
        feat = feat_p if b_pad == B else feat_p[:B]
        return out, feat

    out_p = pl.pallas_call(
        mlp_kernel_out_only,
        out_shape=jax.ShapeDtypeStruct((b_pad, out_pad), jnp.float32),
        grid=(n_blocks,),
        in_specs=in_specs,
        out_specs=act_spec(out_pad),
        compiler_params=cp,
    )(*args)
    return out_p if (b_pad == B and out_pad == out_dim) else out_p[:B, :out_dim]


def init_params(key, in_dim, hid_dim, out_dim):
    """Deterministic init mimicking nn.Linear default: U(-1/sqrt(fan_in), 1/sqrt(fan_in)).
    Weights are stored transposed: [in_features, out_features]."""
    def linear(k, fin, fout):
        kw, kb = jax.random.split(k)
        bound = 1.0 / jnp.sqrt(fin)
        w = jax.random.uniform(kw, (fin, fout), jnp.float32, -bound, bound)
        b = jax.random.uniform(kb, (1, fout), jnp.float32, -bound, bound)
        return w, b

    k1, k2, k3, k4 = jax.random.split(key, 4)
    w1, b1 = linear(k1, in_dim, hid_dim)
    w2, b2 = linear(k2, hid_dim, hid_dim)
    w3, b3 = linear(k3, hid_dim, hid_dim)
    w4, b4 = linear(k4, hid_dim, out_dim)
    return dict(w1=w1, b1=b1, w2=w2, b2=b2, w3=w3, b3=b3, w4=w4, b4=b4)


def reference_forward_bf16(x, params):
    """Pure-JAX reference with the same bf16-operand / f32-accumulate recipe."""
    bf16 = jnp.bfloat16
    h = x.reshape(x.shape[0], -1).astype(bf16)
    h = _leaky_relu(jnp.dot(h, params["w1"].astype(bf16),
                            preferred_element_type=jnp.float32) + params["b1"])
    h = _leaky_relu(jnp.dot(h.astype(bf16), params["w2"].astype(bf16),
                            preferred_element_type=jnp.float32) + params["b2"])
    feat = jnp.dot(h.astype(bf16), params["w3"].astype(bf16),
                   preferred_element_type=jnp.float32) + params["b3"]
    h = _leaky_relu(feat)
    out = jnp.dot(h.astype(bf16), params["w4"].astype(bf16),
                  preferred_element_type=jnp.float32) + params["b4"]
    return out, feat


if __name__ == "__main__":
    # Small shapes consistent with the module: NCHW input flattened to in_dim.
    B, C, H, W = 2, 4, 16, 16
    in_dim = C * H * W           # 1024
    hid_dim = 128
    out_dim = 32

    key = jax.random.PRNGKey(0)
    kx, kp = jax.random.split(key)
    x = jax.random.normal(kx, (B, C, H, W), jnp.float32)
    params = init_params(kp, in_dim, hid_dim, out_dim)

    # return_feats=True path (feat output emitted)
    out, feat = example_mlp_forward(x, params, return_feats=True)
    out = jax.block_until_ready(out)
    feat = jax.block_until_ready(feat)

    # return_feats=False path (no feat HBM writeback)
    out_only = jax.block_until_ready(example_mlp_forward(x, params, return_feats=False))

    ref_out, ref_feat = reference_forward_bf16(x, params)
    # bf16-operand matmuls: tolerance loosened accordingly (f32 accumulation).
    assert out.shape == (B, out_dim) and feat.shape == (B, hid_dim)
    assert out_only.shape == (B, out_dim)
    assert jnp.allclose(out, ref_out, atol=2e-2, rtol=2e-2)
    assert jnp.allclose(feat, ref_feat, atol=2e-2, rtol=2e-2)
    assert jnp.allclose(out_only, ref_out, atol=2e-2, rtol=2e-2)
    assert jnp.all(jnp.isfinite(out)) and jnp.all(jnp.isfinite(feat))

    print("KERNEL_OK")
</pallas_src>

<mosaic_0001>
module attributes {stable_mosaic.version = 11 : i64} {
  func.func @mlp_kernel_with_feat(%arg0: i32, %arg1: memref<8x1024xf32, #tpu.memory_space<vmem>>, %arg2: memref<1024x128xbf16, #tpu.memory_space<vmem>>, %arg3: memref<1x128xf32, #tpu.memory_space<vmem>>, %arg4: memref<128x128xbf16, #tpu.memory_space<vmem>>, %arg5: memref<1x128xf32, #tpu.memory_space<vmem>>, %arg6: memref<128x128xbf16, #tpu.memory_space<vmem>>, %arg7: memref<1x128xf32, #tpu.memory_space<vmem>>, %arg8: memref<128x128xbf16, #tpu.memory_space<vmem>>, %arg9: memref<1x128xf32, #tpu.memory_space<vmem>>, %arg10: memref<8x128xf32, #tpu.memory_space<vmem>>, %arg11: memref<8x128xf32, #tpu.memory_space<vmem>>) attributes {dimension_semantics = [#tpu.dimension_semantics<parallel>], iteration_bounds = array<i64: 1>, scalar_prefetch = 0 : i64, scratch_operands = 0 : i64, tpu.core_type = #tpu.core_type<tc>, window_params = [{transform_indices = @transform_0, window_bounds = array<i64: 8, 1024>}, {pipeline_mode = #tpu.pipeline_mode<synchronous>, transform_indices = @transform_1, window_bounds = array<i64: 1024, 128>}, {pipeline_mode = #tpu.pipeline_mode<synchronous>, transform_indices = @transform_2, window_bounds = array<i64: 1, 128>}, {pipeline_mode = #tpu.pipeline_mode<synchronous>, transform_indices = @transform_3, window_bounds = array<i64: 128, 128>}, {pipeline_mode = #tpu.pipeline_mode<synchronous>, transform_indices = @transform_4, window_bounds = array<i64: 1, 128>}, {pipeline_mode = #tpu.pipeline_mode<synchronous>, transform_indices = @transform_5, window_bounds = array<i64: 128, 128>}, {pipeline_mode = #tpu.pipeline_mode<synchronous>, transform_indices = @transform_6, window_bounds = array<i64: 1, 128>}, {pipeline_mode = #tpu.pipeline_mode<synchronous>, transform_indices = @transform_7, window_bounds = array<i64: 128, 128>}, {pipeline_mode = #tpu.pipeline_mode<synchronous>, transform_indices = @transform_8, window_bounds = array<i64: 1, 128>}, {transform_indices = @transform_9, window_bounds = array<i64: 8, 128>}, {transform_indices = @transform_10, window_bounds = array<i64: 8, 128>}]} {
    %c0 = arith.constant 0 : index
    %c0_0 = arith.constant 0 : index
    %0 = vector.load %arg1[%c0, %c0_0] : memref<8x1024xf32, #tpu.memory_space<vmem>>, vector<8x1024xf32>
    %1 = arith.truncf %0 : vector<8x1024xf32> to vector<8x1024xbf16>
    %c0_1 = arith.constant 0 : index
    %c0_2 = arith.constant 0 : index
    %2 = vector.load %arg2[%c0_1, %c0_2] : memref<1024x128xbf16, #tpu.memory_space<vmem>>, vector<1024x128xbf16>
    %cst = arith.constant dense<0.000000e+00> : vector<8x128xf32>
    %3 = tpu.matmul %1, %2, %cst {dimension_numbers = #tpu.dot_dimension_numbers<[1], [0], [0], [1], [0, 0, 1, 1], [], []>} : vector<8x1024xbf16>, vector<1024x128xbf16>, vector<8x128xf32> -> vector<8x128xf32>
    %c0_3 = arith.constant 0 : index
    %c0_4 = arith.constant 0 : index
    %4 = vector.load %arg3[%c0_3, %c0_4] : memref<1x128xf32, #tpu.memory_space<vmem>>, vector<1x128xf32>
    %5 = vector.broadcast %4 : vector<1x128xf32> to vector<8x128xf32>
    %6 = arith.addf %3, %5 : vector<8x128xf32>
    %cst_5 = arith.constant 0.000000e+00 : f32
    %7 = vector.broadcast %cst_5 : f32 to vector<8x128xf32>
    %8 = arith.cmpf ogt, %6, %7 : vector<8x128xf32>
    %cst_6 = arith.constant 2.000000e-01 : f32
    %9 = vector.broadcast %cst_6 : f32 to vector<8x128xf32>
    %10 = arith.mulf %9, %6 : vector<8x128xf32>
    %11 = arith.select %8, %6, %10 : vector<8x128xi1>, vector<8x128xf32>
    %12 = arith.truncf %11 : vector<8x128xf32> to vector<8x128xbf16>
    %c0_7 = arith.constant 0 : index
    %c0_8 = arith.constant 0 : index
    %13 = vector.load %arg4[%c0_7, %c0_8] : memref<128x128xbf16, #tpu.memory_space<vmem>>, vector<128x128xbf16>
    %cst_9 = arith.constant dense<0.000000e+00> : vector<8x128xf32>
    %14 = tpu.matmul %12, %13, %cst_9 {dimension_numbers = #tpu.dot_dimension_numbers<[1], [0], [0], [1], [0, 0, 1, 1], [], []>} : vector<8x128xbf16>, vector<128x128xbf16>, vector<8x128xf32> -> vector<8x128xf32>
    %c0_10 = arith.constant 0 : index
    %c0_11 = arith.constant 0 : index
    %15 = vector.load %arg5[%c0_10, %c0_11] : memref<1x128xf32, #tpu.memory_space<vmem>>, vector<1x128xf32>
    %16 = vector.broadcast %15 : vector<1x128xf32> to vector<8x128xf32>
    %17 = arith.addf %14, %16 : vector<8x128xf32>
    %cst_12 = arith.constant 0.000000e+00 : f32
    %18 = vector.broadcast %cst_12 : f32 to vector<8x128xf32>
    %19 = arith.cmpf ogt, %17, %18 : vector<8x128xf32>
    %cst_13 = arith.constant 2.000000e-01 : f32
    %20 = vector.broadcast %cst_13 : f32 to vector<8x128xf32>
    %21 = arith.mulf %20, %17 : vector<8x128xf32>
    %22 = arith.select %19, %17, %21 : vector<8x128xi1>, vector<8x128xf32>
    %23 = arith.truncf %22 : vector<8x128xf32> to vector<8x128xbf16>
    %c0_14 = arith.constant 0 : index
    %c0_15 = arith.constant 0 : index
    %24 = vector.load %arg6[%c0_14, %c0_15] : memref<128x128xbf16, #tpu.memory_space<vmem>>, vector<128x128xbf16>
    %cst_16 = arith.constant dense<0.000000e+00> : vector<8x128xf32>
    %25 = tpu.matmul %23, %24, %cst_16 {dimension_numbers = #tpu.dot_dimension_numbers<[1], [0], [0], [1], [0, 0, 1, 1], [], []>} : vector<8x128xbf16>, vector<128x128xbf16>, vector<8x128xf32> -> vector<8x128xf32>
    %c0_17 = arith.constant 0 : index
    %c0_18 = arith.constant 0 : index
    %26 = vector.load %arg7[%c0_17, %c0_18] : memref<1x128xf32, #tpu.memory_space<vmem>>, vector<1x128xf32>
    %27 = vector.broadcast %26 : vector<1x128xf32> to vector<8x128xf32>
    %28 = arith.addf %25, %27 : vector<8x128xf32>
    %cst_19 = arith.constant 0.000000e+00 : f32
    %29 = vector.broadcast %cst_19 : f32 to vector<8x128xf32>
    %30 = arith.cmpf ogt, %28, %29 : vector<8x128xf32>
    %cst_20 = arith.constant 2.000000e-01 : f32
    %31 = vector.broadcast %cst_20 : f32 to vector<8x128xf32>
    %32 = arith.mulf %31, %28 : vector<8x128xf32>
    %33 = arith.select %30, %28, %32 : vector<8x128xi1>, vector<8x128xf32>
    %34 = arith.truncf %33 : vector<8x128xf32> to vector<8x128xbf16>
    %c0_21 = arith.constant 0 : index
    %c0_22 = arith.constant 0 : index
    %35 = vector.load %arg8[%c0_21, %c0_22] : memref<128x128xbf16, #tpu.memory_space<vmem>>, vector<128x128xbf16>
    %cst_23 = arith.constant dense<0.000000e+00> : vector<8x128xf32>
    %36 = tpu.matmul %34, %35, %cst_23 {dimension_numbers = #tpu.dot_dimension_numbers<[1], [0], [0], [1], [0, 0, 1, 1], [], []>} : vector<8x128xbf16>, vector<128x128xbf16>, vector<8x128xf32> -> vector<8x128xf32>
    %c0_24 = arith.constant 0 : index
    %c0_25 = arith.constant 0 : index
    %37 = vector.load %arg9[%c0_24, %c0_25] : memref<1x128xf32, #tpu.memory_space<vmem>>, vector<1x128xf32>
    %38 = vector.broadcast %37 : vector<1x128xf32> to vector<8x128xf32>
    %39 = arith.addf %36, %38 : vector<8x128xf32>
    %c0_26 = arith.constant 0 : index
    %c0_27 = arith.constant 0 : index
    %40 = vector.load %arg10[%c0_26, %c0_27] : memref<8x128xf32, #tpu.memory_space<vmem>>, vector<8x128xf32>
    tpu.vector_store %arg10[%c0_26, %c0_27], %39 {strides = array<i32>} : memref<8x128xf32, #tpu.memory_space<vmem>>, vector<8x128xf32>,
    %c0_28 = arith.constant 0 : index
    %c0_29 = arith.constant 0 : index
    %41 = vector.load %arg11[%c0_28, %c0_29] : memref<8x128xf32, #tpu.memory_space<vmem>>, vector<8x128xf32>
    tpu.vector_store %arg11[%c0_28, %c0_29], %28 {strides = array<i32>} : memref<8x128xf32, #tpu.memory_space<vmem>>, vector<8x128xf32>,
    return
  }
  func.func @transform_0(%arg0: i32) -> (i32, i32) {
    %c0_i32 = arith.constant 0 : i32
    %c0_i32_0 = arith.constant 0 : i32
    return %arg0, %c0_i32 : i32, i32
  }
  func.func @transform_1(%arg0: i32) -> (i32, i32) {
    %c0_i32 = arith.constant 0 : i32
    %c0_i32_0 = arith.constant 0 : i32
    %c0_i32_1 = arith.constant 0 : i32
    return %c0_i32, %c0_i32_0 : i32, i32
  }
  func.func @transform_2(%arg0: i32) -> (i32, i32) {
    %c0_i32 = arith.constant 0 : i32
    %c0_i32_0 = arith.constant 0 : i32
    %c0_i32_1 = arith.constant 0 : i32
    return %c0_i32, %c0_i32_0 : i32, i32
  }
  func.func @transform_3(%arg0: i32) -> (i32, i32) {
    %c0_i32 = arith.constant 0 : i32
    %c0_i32_0 = arith.constant 0 : i32
    %c0_i32_1 = arith.constant 0 : i32
    return %c0_i32, %c0_i32_0 : i32, i32
  }
  func.func @transform_4(%arg0: i32) -> (i32, i32) {
    %c0_i32 = arith.constant 0 : i32
    %c0_i32_0 = arith.constant 0 : i32
    %c0_i32_1 = arith.constant 0 : i32
    return %c0_i32, %c0_i32_0 : i32, i32
  }
  func.func @transform_5(%arg0: i32) -> (i32, i32) {
    %c0_i32 = arith.constant 0 : i32
    %c0_i32_0 = arith.constant 0 : i32
    %c0_i32_1 = arith.constant 0 : i32
    return %c0_i32, %c0_i32_0 : i32, i32
  }
  func.func @transform_6(%arg0: i32) -> (i32, i32) {
    %c0_i32 = arith.constant 0 : i32
    %c0_i32_0 = arith.constant 0 : i32
    %c0_i32_1 = arith.constant 0 : i32
    return %c0_i32, %c0_i32_0 : i32, i32
  }
  func.func @transform_7(%arg0: i32) -> (i32, i32) {
    %c0_i32 = arith.constant 0 : i32
    %c0_i32_0 = arith.constant 0 : i32
    %c0_i32_1 = arith.constant 0 : i32
    return %c0_i32, %c0_i32_0 : i32, i32
  }
  func.func @transform_8(%arg0: i32) -> (i32, i32) {
    %c0_i32 = arith.constant 0 : i32
    %c0_i32_0 = arith.constant 0 : i32
    %c0_i32_1 = arith.constant 0 : i32
    return %c0_i32, %c0_i32_0 : i32, i32
  }
  func.func @transform_9(%arg0: i32) -> (i32, i32) {
    %c0_i32 = arith.constant 0 : i32
    %c0_i32_0 = arith.constant 0 : i32
    return %arg0, %c0_i32 : i32, i32
  }
  func.func @transform_10(%arg0: i32) -> (i32, i32) {
    %c0_i32 = arith.constant 0 : i32
    %c0_i32_0 = arith.constant 0 : i32
    return %arg0, %c0_i32 : i32, i32
  }
}

</mosaic_0001>

<bundles_post_ra>
// kernel: tpu_custom_call.1
= control target key start
LH: loop header
LB: loop body
LE: loop exit
PB: predicated region body
PF: predicated region fallthrough
CT: control target
= control target key end

     0   :  { %16 = vsyncpa [#allocation3], 0  ;;  %s1768_s0 = inlined_call_operand.hbm [shape: f32[8,1024], index: 0, kind: input, shape index: {}]   ;;  %s1769_s1 = inlined_call_operand.hbm [shape: bf16[1024,128], index: 1, kind: input, shape index: {}]   ;;  %s1770_s2 = inlined_call_operand.vmem [shape: f32[1,128], index: 2, kind: input, shape index: {}]   ;;  %s1771_s3 = inlined_call_operand.hbm [shape: bf16[128,128], index: 3, kind: input, shape index: {}]   ;;  %s1772_s4 = inlined_call_operand.vmem [shape: f32[1,128], index: 4, kind: input, shape index: {}]   ;;  %s1773_s5 = inlined_call_operand.hbm [shape: bf16[128,128], index: 5, kind: input, shape index: {}]   ;;  %s1774_s6 = inlined_call_operand.vmem [shape: f32[1,128], index: 6, kind: input, shape index: {}]   ;;  %s1775_s7 = inlined_call_operand.hbm [shape: bf16[128,128], index: 7, kind: input, shape index: {}]   ;;  %s1776_s8 = inlined_call_operand.vmem [shape: f32[1,128], index: 8, kind: input, shape index: {}]   ;;  %s1777_s9 = inlined_call_operand.hbm [shape: f32[8,128], index: 9, kind: output, shape index: {0}]   ;;  %s1778_s10 = inlined_call_operand.hbm [shape: f32[8,128], index: 10, kind: output, shape index: {1}]  }
   0x1   :  { %17 = vsyncpa [#allocation6], 0 }
   0x2   :  { %18 = vsyncpa [#allocation9], 0 }
   0x3   :  { %19 = vsyncpa [#allocation4], 0  ;;  %s36_s15 = sshll.u32 %s1769_s1, 4  ;;  %s37_s15 = int_to_ptr.hbm [resolvable:$true] %s36_s15 }
   0x4   :  { %20 = vsyncpa [#allocation13], 0  ;;  %s1671_s16 = smov [#allocation5]   ;;  %s66_s20 = sshll.u32 %s1773_s5, 4  ;;  %s67_s20 = int_to_ptr.hbm [resolvable:$true] %s66_s20 }
   0x5   :  { %s38_s17 = sshll.u32 %s1671_s16, 4  ;;  %s1672_s21 = smov 64   ;;  %s39_s17 = int_to_ptr.vmem [resolvable:$true] %s38_s17 }
   0x6   :  { %s1673_s22 = smov 4   ;;  %s1674_s23 = smov [#allocation8]  }
   0x7   :  { %44 = dma.hbm_to_vmem [thread:$0]  %s37_s15, 8192, %s39_s17, [#allocation6], %s1672_s21, %s1672_s21, %s1673_s22  }
   0x8   :  { %s68_s24 = sshll.u32 %s1674_s23, 4  ;;  %s26_s27 = sshll.u32 %s1768_s0, 4  ;;  %s69_s24 = int_to_ptr.vmem [resolvable:$true] %s68_s24  ;;  %s27_s27 = int_to_ptr.hbm [resolvable:$true] %s26_s27 }
   0x9   :  { %74 = dma.hbm_to_vmem [thread:$0]  %s67_s20, 1024, %s69_s24, [#allocation9], %s1672_s21, %s1672_s21, %s1673_s22  }
   0xa   :  { %s51_s29 = sshll.u32 %s1771_s3, 4  ;;  %s1675_s30 = smov [#allocation2]   ;;  %s52_s29 = int_to_ptr.hbm [resolvable:$true] %s51_s29 }
   0xb   :  { %s28_s11 = sshll.u32 %s1675_s30, 4  ;;  %s1676_s5 = smov [#allocation7]   ;;  %s29_s11 = int_to_ptr.vmem [resolvable:$true] %s28_s11 }
   0xc   :  { %31 = dma.hbm_to_vmem [thread:$0]  %s27_s27, 1024, %s29_s11, [#allocation3]  }
   0xd   :  { %s53_s12 = sshll.u32 %s1676_s5, 4  ;;  %s81_s15 = sshll.u32 %s1775_s7, 4  ;;  %s54_s12 = int_to_ptr.vmem [resolvable:$true] %s53_s12  ;;  %s82_s15 = int_to_ptr.hbm [resolvable:$true] %s81_s15 }
   0xe   :  { %59 = dma.hbm_to_vmem [thread:$0]  %s52_s29, 1024, %s54_s12, [#allocation6], %s1672_s21, %s1672_s21, %s1673_s22  }
   0xf   :  { %s1677_s0 = smov [#allocation10]  }
  0x10   :  { %s83_s16 = sshll.u32 %s1677_s0, 4  ;;  %s84_s16 = int_to_ptr.vmem [resolvable:$true] %s83_s16 }
  0x11   :  { %89 = dma.hbm_to_vmem [thread:$0]  %s82_s15, 1024, %s84_s16, [#allocation9], %s1672_s21, %s1672_s21, %s1673_s22  }
  0x12   :  { %1661 = dma.done.wait [#allocation3], 1024  }
  0x13   :  { %1662 = vsyncadd [#allocation3], 4294966272 }
  0x14   :  { %1663 = dma.done.wait [#allocation6], 9216  }
  0x15   :  { %1664 = vsyncadd [#allocation6], 4294958080 }
  0x16   :  { %1665 = dma.done.wait [#allocation9], 2048  }
  0x17   :  { %1666 = vsyncadd [#allocation9], 4294965248  ;;  %v1399_v0 = vld [vmem:[#allocation5 + $0x38] sm:$0xff]  ;;  %v1398_v4 = vld [vmem:[#allocation5 + $0x30] sm:$0xff]  ;;  %s1023_s23 = sshll.u32 %s1778_s10, 4  ;;  %s1679_s25 = smov [#allocation11]   ;;  %s1024_s23 = int_to_ptr.hbm [resolvable:$true] %s1023_s23 }
  0x18   :  { %v1407_v1 = vld [vmem:[#allocation5 + $0x78] sm:$0xff]  ;;  %644 = vmatpush.bf16.msra.mxu0 %v1399_v0  ;;  %v1406_v5 = vld [vmem:[#allocation5 + $0x70] sm:$0xff]  ;;  %v1397_v8 = vld [vmem:[#allocation5 + $0x28] sm:$0xff]  ;;  %s1010_s26 = sshll.u32 %s1679_s25, 4  ;;  %s1012_s28 = sshll.u32 %s1777_s9, 4  ;;  %s1011_s26 = int_to_ptr.vmem [resolvable:$true] %s1010_s26  ;;  %s1013_s28 = int_to_ptr.hbm [resolvable:$true] %s1012_s28 }
  0x19   :  { %v1415_v2 = vld [vmem:[#allocation5 + $0xb8] sm:$0xff]  ;;  %657 = vmatpush.bf16.msra.mxu1 %v1407_v1  ;;  %v1414_v6 = vld [vmem:[#allocation5 + $0xb0] sm:$0xff]  ;;  %v1405_v9 = vld [vmem:[#allocation5 + $0x68] sm:$0xff] }
  0x1a   :  { %v1423_v3 = vld [vmem:[#allocation5 + $0xf8] sm:$0xff]  ;;  %670 = vmatpush.bf16.msra.mxu2 %v1415_v2  ;;  %v1422_v7 = vld [vmem:[#allocation5 + $0xf0] sm:$0xff]  ;;  %v1413_v10 = vld [vmem:[#allocation5 + $0xa8] sm:$0xff] }
  0x1b   :  { %683 = vmatpush.bf16.msra.mxu3 %v1423_v3  ;;  %v1421_v11 = vld [vmem:[#allocation5 + $0xe8] sm:$0xff]  ;;  %v1396_v12 = vld [vmem:[#allocation5 + $0x20] sm:$0xff]  ;;  %v1395_v16 = vld [vmem:[#allocation5 + $0x18] sm:$0xff] }
  0x1c   :  { %645 = vmatpush.bf16.msra.mxu0 %v1398_v4  ;;  %v1404_v13 = vld [vmem:[#allocation5 + $0x60] sm:$0xff]  ;;  %v1403_v17 = vld [vmem:[#allocation5 + $0x58] sm:$0xff]  ;;  %v1394_v20 = vld [vmem:[#allocation5 + $0x10] sm:$0xff] }
  0x1d   :  { %658 = vmatpush.bf16.msra.mxu1 %v1406_v5  ;;  %v1412_v14 = vld [vmem:[#allocation5 + $0xa0] sm:$0xff]  ;;  %v1411_v18 = vld [vmem:[#allocation5 + $0x98] sm:$0xff]  ;;  %v1402_v21 = vld [vmem:[#allocation5 + $0x50] sm:$0xff] }
  0x1e   :  { %671 = vmatpush.bf16.msra.mxu2 %v1414_v6  ;;  %v1420_v15 = vld [vmem:[#allocation5 + $0xe0] sm:$0xff]  ;;  %v1419_v19 = vld [vmem:[#allocation5 + $0xd8] sm:$0xff]  ;;  %v1410_v22 = vld [vmem:[#allocation5 + $0x90] sm:$0xff] }
  0x1f   :  { %684 = vmatpush.bf16.msra.mxu3 %v1422_v7  ;;  %v1418_v23 = vld [vmem:[#allocation5 + $0xd0] sm:$0xff]  ;;  %v1393_v24 = vld [vmem:[#allocation5 + $0x8] sm:$0xff]  ;;  %v1392_v28 = vld [vmem:[#allocation5] sm:$0xff] }
  0x20   :  { %646 = vmatpush.bf16.msra.mxu0 %v1397_v8  ;;  %v1401_v25 = vld [vmem:[#allocation5 + $0x48] sm:$0xff]  ;;  %v1400_v29 = vld [vmem:[#allocation5 + $0x40] sm:$0xff]  ;;  %v1431_v32 = vld [vmem:[#allocation5 + $0x138] sm:$0xff] }
  0x21   :  { %659 = vmatpush.bf16.msra.mxu1 %v1405_v9  ;;  %v1409_v26 = vld [vmem:[#allocation5 + $0x88] sm:$0xff]  ;;  %v1408_v30 = vld [vmem:[#allocation5 + $0x80] sm:$0xff]  ;;  %v114_v33 = vld [vmem:[#allocation2 + $0x10] sm:$0xff] }
  0x22   :  { %672 = vmatpush.bf16.msra.mxu2 %v1413_v10  ;;  %v1417_v27 = vld [vmem:[#allocation5 + $0xc8] sm:$0xff]  ;;  %v1416_v31 = vld [vmem:[#allocation5 + $0xc0] sm:$0xff]  ;;  %v1439_v35 = vld [vmem:[#allocation5 + $0x178] sm:$0xff]  ;;  %v122_v40 = vpack.c.bf16 %v114_v33, %v114_v33 }
  0x23   :  { %685 = vmatpush.bf16.msra.mxu3 %v1421_v11  ;;  %v112_v34 = vld [vmem:[#allocation2] sm:$0xff]  ;;  %v115_v36 = vld [vmem:[#allocation2 + $0x18] sm:$0xff]  ;;  %v113_v37 = vld [vmem:[#allocation2 + $0x8] sm:$0xff] }
  0x24   :  { %647 = vmatpush.bf16.msra.mxu0 %v1396_v12  ;;  %v1447_v38 = vld [vmem:[#allocation5 + $0x1b8] sm:$0xff]  ;;  %v120_v41 = vpack.c.bf16 %v112_v34, %v112_v34  ;;  %v123_v42 = vpack.c.bf16 %v115_v36, %v115_v36  ;;  %v121_v43 = vpack.c.bf16 %v113_v37, %v113_v37  ;;  %v1430_v44 = vld [vmem:[#allocation5 + $0x130] sm:$0xff]  ;;  %v1429_v48 = vld [vmem:[#allocation5 + $0x128] sm:$0xff] }
  0x25   :  { %660 = vmatpush.bf16.msra.mxu1 %v1404_v13  ;;  %v1455_v39 = vld [vmem:[#allocation5 + $0x1f8] sm:$0xff]  ;;  %v1438_v45 = vld [vmem:[#allocation5 + $0x170] sm:$0xff]  ;;  %v1437_v49 = vld [vmem:[#allocation5 + $0x168] sm:$0xff] }
  0x26   :  { %673 = vmatpush.bf16.msra.mxu2 %v1412_v14  ;;  %v1446_v46 = vld [vmem:[#allocation5 + $0x1b0] sm:$0xff]  ;;  %v1445_v50 = vld [vmem:[#allocation5 + $0x1a8] sm:$0xff]  ;;  %v1428_v52 = vld [vmem:[#allocation5 + $0x120] sm:$0xff] }
  0x27   :  { %686 = vmatpush.bf16.msra.mxu3 %v1420_v15  ;;  %v1454_v47 = vld [vmem:[#allocation5 + $0x1f0] sm:$0xff]  ;;  %v1453_v51 = vld [vmem:[#allocation5 + $0x1e8] sm:$0xff]  ;;  %v1436_v53 = vld [vmem:[#allocation5 + $0x160] sm:$0xff] }
  0x28   :  { %648 = vmatpush.bf16.msra.mxu0 %v1395_v16  ;;  %v1444_v54 = vld [vmem:[#allocation5 + $0x1a0] sm:$0xff]  ;;  %v1427_v56 = vld [vmem:[#allocation5 + $0x118] sm:$0xff]  ;;  %v1426_v60 = vld [vmem:[#allocation5 + $0x110] sm:$0xff] }
  0x29   :  { %661 = vmatpush.bf16.msra.mxu1 %v1403_v17  ;;  %v1452_v55 = vld [vmem:[#allocation5 + $0x1e0] sm:$0xff]  ;;  %v1435_v57 = vld [vmem:[#allocation5 + $0x158] sm:$0xff]  ;;  %v1434_v61 = vld [vmem:[#allocation5 + $0x150] sm:$0xff] }
  0x2a   :  { %674 = vmatpush.bf16.msra.mxu2 %v1411_v18  ;;  %v1443_v58 = vld [vmem:[#allocation5 + $0x198] sm:$0xff]  ;;  %v1442_v62 = vld [vmem:[#allocation5 + $0x190] sm:$0xff]  ;;  %v1425_v0 = vld [vmem:[#allocation5 + $0x108] sm:$0xff] }
  0x2b   :  { %687 = vmatpush.bf16.msra.mxu3 %v1419_v19  ;;  %v1451_v59 = vld [vmem:[#allocation5 + $0x1d8] sm:$0xff]  ;;  %v1450_v63 = vld [vmem:[#allocation5 + $0x1d0] sm:$0xff]  ;;  %v1433_v1 = vld [vmem:[#allocation5 + $0x148] sm:$0xff] }
  0x2c   :  { %649 = vmatpush.bf16.msra.mxu0 %v1394_v20  ;;  %v1441_v2 = vld [vmem:[#allocation5 + $0x188] sm:$0xff]  ;;  %v1424_v4 = vld [vmem:[#allocation5 + $0x100] sm:$0xff]  ;;  %v118_v10 = vld [vmem:[#allocation2 + $0x30] sm:$0xff] }
  0x2d   :  { %662 = vmatpush.bf16.msra.mxu1 %v1402_v21  ;;  %v1449_v3 = vld [vmem:[#allocation5 + $0x1c8] sm:$0xff]  ;;  %v1432_v5 = vld [vmem:[#allocation5 + $0x140] sm:$0xff]  ;;  %v119_v11 = vld [vmem:[#allocation2 + $0x38] sm:$0xff]  ;;  %v126_v14 = vpack.c.bf16 %v118_v10, %v118_v10 }
  0x2e   :  { %675 = vmatpush.bf16.msra.mxu2 %v1410_v22  ;;  %v1440_v6 = vld [vmem:[#allocation5 + $0x180] sm:$0xff]  ;;  %v117_v8 = vld [vmem:[#allocation2 + $0x28] sm:$0xff]  ;;  %v127_v15 = vpack.c.bf16 %v119_v11, %v119_v11  ;;  %v1463_v16 = vld [vmem:[#allocation7 + $0x38] sm:$0xff] }
  0x2f   :  { %688 = vmatpush.bf16.msra.mxu3 %v1418_v23  ;;  %v116_v7 = vld [vmem:[#allocation2 + $0x20] sm:$0xff]  ;;  %v125_v13 = vpack.c.bf16 %v117_v8, %v117_v8  ;;  %v1462_v17 = vld [vmem:[#allocation7 + $0x30] sm:$0xff]  ;;  %v1461_v18 = vld [vmem:[#allocation7 + $0x28] sm:$0xff] }
  0x30   :  { %650 = vmatpush.bf16.msra.mxu0 %v1393_v24  ;;  %v1448_v9 = vld [vmem:[#allocation5 + $0x1c0] sm:$0xff]  ;;  %v124_v12 = vpack.c.bf16 %v116_v7, %v116_v7  ;;  %v1459_v20 = vld [vmem:[#allocation7 + $0x18] sm:$0xff]  ;;  %v1458_v22 = vld [vmem:[#allocation7 + $0x10] sm:$0xff] }
  0x31   :  { %663 = vmatpush.bf16.msra.mxu1 %v1401_v25  ;;  %v1460_v19 = vld [vmem:[#allocation7 + $0x20] sm:$0xff]  ;;  %v1457_v24 = vld [vmem:[#allocation7 + $0x8] sm:$0xff]  ;;  %v1470_v34 = vld [vmem:[#allocation8 + $0x30] sm:$0xff] }
  0x32   :  { %676 = vmatpush.bf16.msra.mxu2 %v1409_v26  ;;  %v1469_v36 = vld [vmem:[#allocation8 + $0x28] sm:$0xff]  ;;  %v1472_v10 = vld [vmem:[#allocation10] sm:$0xff] }
  0x33   :  { %689 = vmatpush.bf16.msra.mxu3 %v1417_v27  ;;  %v1491_v11 = vld [vmem:[%s1774_s6] ss:$0 sm:$0xff] }
  0x34   :  { %651 = vmatpush.bf16.msra.mxu0 %v1392_v28 }
  0x35   :  { %664 = vmatpush.bf16.msra.mxu1 %v1400_v29  ;;  %v1456_v29 = vld [vmem:[#allocation7] sm:$0xff] }
  0x36   :  { %677 = vmatpush.bf16.msra.mxu2 %v1408_v30  ;;  %v1489_v30 = vld [vmem:[%s1770_s2] ss:$0 sm:$0xff] }
  0x37   :  { %690 = vmatpush.bf16.msra.mxu3 %v1416_v31  ;;  %652 = vmatmul.bf16.vlgmr.msra.gmra.mxu0 %v120_v41 }
  0x38   :  { %696 = vmatpush.bf16.msrb.mxu0 %v1431_v32  ;;  %665 = vmatmul.bf16.vlgmr.msra.gmra.mxu1 %v121_v43  ;;  %v1471_v32 = vld [vmem:[#allocation8 + $0x38] sm:$0xff] }
  0x39   :  { %709 = vmatpush.bf16.msrb.mxu1 %v1439_v35  ;;  %678 = vmatmul.bf16.vlgmr.msra.gmra.mxu2 %v122_v40  ;;  %v1467_v40 = vld [vmem:[#allocation8 + $0x18] sm:$0xff] }
  0x3a   :  { %722 = vmatpush.bf16.msrb.mxu2 %v1447_v38  ;;  %691 = vmatmul.bf16.vlgmr.msra.gmra.mxu3 %v123_v42  ;;  %v1468_v38 = vld [vmem:[#allocation8 + $0x20] sm:$0xff] }
  0x3b   :  { %735 = vmatpush.bf16.msrb.mxu3 %v1455_v39 }
  0x3c   :  { %697 = vmatpush.bf16.msrb.mxu0 %v1430_v44 }
  0x3d   :  { %710 = vmatpush.bf16.msrb.mxu1 %v1438_v45  ;;  %v1466_v45 = vld [vmem:[#allocation8 + $0x10] sm:$0xff] }
  0x3e   :  { %723 = vmatpush.bf16.msrb.mxu2 %v1446_v46 }
  0x3f   :  { %736 = vmatpush.bf16.msrb.mxu3 %v1454_v47 }
  0x40   :  { %698 = vmatpush.bf16.msrb.mxu0 %v1429_v48 }
  0x41   :  { %711 = vmatpush.bf16.msrb.mxu1 %v1437_v49 }
  0x42   :  { %724 = vmatpush.bf16.msrb.mxu2 %v1445_v50 }
  0x43   :  { %737 = vmatpush.bf16.msrb.mxu3 %v1453_v51 }
  0x44   :  { %699 = vmatpush.bf16.msrb.mxu0 %v1428_v52 }
  0x45   :  { %712 = vmatpush.bf16.msrb.mxu1 %v1436_v53 }
  0x46   :  { %725 = vmatpush.bf16.msrb.mxu2 %v1444_v54 }
  0x47   :  { %738 = vmatpush.bf16.msrb.mxu3 %v1452_v55 }
  0x48   :  { %700 = vmatpush.bf16.msrb.mxu0 %v1427_v56 }
  0x49   :  { %713 = vmatpush.bf16.msrb.mxu1 %v1435_v57 }
  0x4a   :  { %726 = vmatpush.bf16.msrb.mxu2 %v1443_v58  ;;  %v1465_v58 = vld [vmem:[#allocation8 + $0x8] sm:$0xff] }
  0x4b   :  { %739 = vmatpush.bf16.msrb.mxu3 %v1451_v59  ;;  %v1464_v59 = vld [vmem:[#allocation8] sm:$0xff] }
  0x4c   :  { %701 = vmatpush.bf16.msrb.mxu0 %v1426_v60  ;;  %v1479_v60 = vld [vmem:[#allocation10 + $0x38] sm:$0xff] }
  0x4d   :  { %714 = vmatpush.bf16.msrb.mxu1 %v1434_v61  ;;  %v1478_v61 = vld [vmem:[#allocation10 + $0x30] sm:$0xff] }
  0x4e   :  { %727 = vmatpush.bf16.msrb.mxu2 %v1442_v62  ;;  %v1477_v62 = vld [vmem:[#allocation10 + $0x28] sm:$0xff] }
  0x4f   :  { %740 = vmatpush.bf16.msrb.mxu3 %v1450_v63  ;;  %v1476_v63 = vld [vmem:[#allocation10 + $0x20] sm:$0xff] }
  0x50   :  { %702 = vmatpush.bf16.msrb.mxu0 %v1425_v0  ;;  %v1475_v0 = vld [vmem:[#allocation10 + $0x18] sm:$0xff] }
  0x51   :  { %715 = vmatpush.bf16.msrb.mxu1 %v1433_v1  ;;  %v1474_v1 = vld [vmem:[#allocation10 + $0x10] sm:$0xff] }
  0x52   :  { %728 = vmatpush.bf16.msrb.mxu2 %v1441_v2  ;;  %v1490_v2 = vld [vmem:[%s1772_s4] ss:$0 sm:$0xff]  ;;  %s1678_s4 = smov [#allocation12]  }
  0x53   :  { %741 = vmatpush.bf16.msrb.mxu3 %v1449_v3  ;;  %s1021_s20 = sshll.u32 %s1678_s4, 4  ;;  %s1022_s20 = int_to_ptr.vmem [resolvable:$true] %s1021_s20 }
  0x54   :  { %703 = vmatpush.bf16.msrb.mxu0 %v1424_v4 }
  0x55   :  { %716 = vmatpush.bf16.msrb.mxu1 %v1432_v5 }
  0x56   :  { %729 = vmatpush.bf16.msrb.mxu2 %v1440_v6 }
  0x57   :  { %742 = vmatpush.bf16.msrb.mxu3 %v1448_v9  ;;  %704 = vmatmul.bf16.vlgmr.msrb.gmra.mxu0 %v124_v12  ;;  %v1473_v9 = vld [vmem:[#allocation10 + $0x8] sm:$0xff] }
  0x58   :  { %717 = vmatmul.bf16.vlgmr.msrb.gmra.mxu1 %v125_v13  ;;  %820 = vmatpush.bf16.msra.mxu0 %v1463_v16 }
  0x59   :  { %730 = vmatmul.bf16.vlgmr.msrb.gmra.mxu2 %v126_v14  ;;  %905 = vmatpush.bf16.msra.mxu1 %v1471_v32 }
  0x5a   :  { %743 = vmatmul.bf16.vlgmr.msrb.gmra.mxu3 %v127_v15  ;;  %990 = vmatpush.bf16.msra.mxu2 %v1479_v60 }
  0x5c   :  { %821 = vmatpush.bf16.msra.mxu0 %v1462_v17 }
  0x5d   :  { %906 = vmatpush.bf16.msra.mxu1 %v1470_v34 }
  0x5e   :  { %991 = vmatpush.bf16.msra.mxu2 %v1478_v61 }
  0x60   :  { %822 = vmatpush.bf16.msra.mxu0 %v1461_v18  ;;  %v1492_v18 = vld [vmem:[%s1776_s8] ss:$0 sm:$0xff] }
  0x61   :  { %907 = vmatpush.bf16.msra.mxu1 %v1469_v36 }
  0x62   :  { %992 = vmatpush.bf16.msra.mxu2 %v1477_v62 }
  0x64   :  { %823 = vmatpush.bf16.msra.mxu0 %v1460_v19 }
  0x65   :  { %908 = vmatpush.bf16.msra.mxu1 %v1468_v38 }
  0x66   :  { %993 = vmatpush.bf16.msra.mxu2 %v1476_v63 }
  0x68   :  { %824 = vmatpush.bf16.msra.mxu0 %v1459_v20 }
  0x69   :  { %909 = vmatpush.bf16.msra.mxu1 %v1467_v40 }
  0x6a   :  { %994 = vmatpush.bf16.msra.mxu2 %v1475_v0 }
  0x6c   :  { %825 = vmatpush.bf16.msra.mxu0 %v1458_v22 }
  0x6d   :  { %910 = vmatpush.bf16.msra.mxu1 %v1466_v45 }
  0x6e   :  { %995 = vmatpush.bf16.msra.mxu2 %v1474_v1 }
  0x70   :  { %826 = vmatpush.bf16.msra.mxu0 %v1457_v24 }
  0x71   :  { %911 = vmatpush.bf16.msra.mxu1 %v1465_v58 }
  0x72   :  { %996 = vmatpush.bf16.msra.mxu2 %v1473_v9 }
  0x74   :  { %827 = vmatpush.bf16.msra.mxu0 %v1456_v29 }
  0x75   :  { %912 = vmatpush.bf16.msra.mxu1 %v1464_v59 }
  0x76   :  { %997 = vmatpush.bf16.msra.mxu2 %v1472_v10 }
  0xb4   :  { %v653_v21 = vpop.f32.mrf.mxu0 }
  0xb5   :  { %v666_v23 = vpop.f32.mrf.mxu1  ;;  %v654_v35 = vadd.f32 %v1489_v30, %v653_v21 }
  0xb7   :  { %v667_v37 = vadd.f32 %v666_v23, %v654_v35 }
  0xbc   :  { %v679_v25 = vpop.f32.mrf.mxu2  ;;  %v655_v27 = vpop.f32.mrf.mxu0 }
  0xbd   :  { %v692_v26 = vpop.f32.mrf.mxu3  ;;  %v668_v28 = vpop.f32.mrf.mxu1  ;;  %v680_v39 = vadd.f32 %v679_v25, %v667_v37 }
  0xbf   :  { %v693_v41 = vadd.f32 %v692_v26, %v680_v39 }
  0xc4   :  { %v681_v31 = vpop.f32.mrf.mxu2 }
  0xc5   :  { %v694_v33 = vpop.f32.mrf.mxu3 }
  0xd4   :  { %v705_v42 = vpop.f32.mrf.mxu0 }
  0xd5   :  { %v718_v43 = vpop.f32.mrf.mxu1  ;;  %v706_v44 = vadd.f32 %v705_v42, %v693_v41 }
  0xd7   :  { %v719_v46 = vadd.f32 %v718_v43, %v706_v44 }
  0xdc   :  { %v731_v47 = vpop.f32.mrf.mxu2  ;;  %v707_v50 = vpop.f32.mrf.mxu0 }
  0xdd   :  { %v744_v48 = vpop.f32.mrf.mxu3  ;;  %v732_v49 = vadd.f32 %v731_v47, %v719_v46  ;;  %v720_v51 = vpop.f32.mrf.mxu1 }
  0xdf   :  { %v745_v52 = vadd.f32 %v744_v48, %v732_v49 }
  0xe1   :  { %vm748_vm0 = vcmp.gt.f32.partialorder %v745_v52, 0.0  ;;  %v749_v53 = vmul.f32 0.2, %v745_v52 }
  0xe3   :  { %v750_v54 = vsel %vm748_vm0, %v745_v52, %v749_v53 }
  0xe4   :  { %v751_v55 = vpack.c.bf16 %v750_v54, %v750_v54  ;;  %v733_v56 = vpop.f32.mrf.mxu2 }
  0xe5   :  { %v746_v57 = vpop.f32.mrf.mxu3 }
  0xe6   :  { %828 = vmatmul.bf16.vlgmr.msra.gmra.mxu0 %v751_v55 }
 0x163   :  { %v829_v3 = vpop.f32.mrf.mxu0 }
 0x164   :  { %v830_v4 = vadd.f32 %v1490_v2, %v829_v3 }
 0x166   :  { %vm833_vm1 = vcmp.gt.f32.partialorder %v830_v4, 0.0  ;;  %v834_v5 = vmul.f32 0.2, %v830_v4 }
 0x168   :  { %v835_v6 = vsel %vm833_vm1, %v830_v4, %v834_v5 }
 0x169   :  { %v836_v7 = vpack.c.bf16 %v835_v6, %v835_v6 }
 0x16b   :  { %v831_v8 = vpop.f32.mrf.mxu0  ;;  %913 = vmatmul.bf16.vlgmr.msra.gmra.mxu1 %v836_v7 }
 0x1e8   :  { %v914_v12 = vpop.f32.mrf.mxu1 }
 0x1e9   :  { %v915_v13 = vadd.f32 %v1491_v11, %v914_v12 }
 0x1eb   :  { %vm918_vm2 = vcmp.gt.f32.partialorder %v915_v13, 0.0  ;;  %v919_v14 = vmul.f32 0.2, %v915_v13  ;;  %1004 = vst [vmem:[#allocation12] sm:$0xff] %v915_v13 }
 0x1ec   :  { %1026 = dma.vmem_to_hbm [thread:$0]  %s1022_s20, 128, %s1024_s23, [#allocation13]  }
 0x1ed   :  { %v920_v15 = vsel %vm918_vm2, %v915_v13, %v919_v14 }
 0x1ee   :  { %v921_v16 = vpack.c.bf16 %v920_v15, %v920_v15 }
 0x1f0   :  { %v916_v17 = vpop.f32.mrf.mxu1  ;;  %998 = vmatmul.bf16.vlgmr.msra.gmra.mxu2 %v921_v16 }
 0x273   :  { %v999_v19 = vpop.f32.mrf.mxu2 }
 0x274   :  { %v1000_v20 = vadd.f32 %v1492_v18, %v999_v19 }
 0x276   :  { %1003 = vst [vmem:[#allocation11] sm:$0xff] %v1000_v20 }
 0x277   :  { %1015 = dma.vmem_to_hbm [thread:$0]  %s1011_s26, 128, %s1013_s28, [#allocation4]  }
 0x27b   :  { %v1001_v21 = vpop.f32.mrf.mxu2 }
 0x27c   :  { %1667 = dma.done.wait [#allocation4], 128  }
 0x27d   :  { %1668 = vsyncadd [#allocation4], 4294967168 }
 0x27e   :  { %1669 = dma.done.wait [#allocation13], 128  }
 0x27f   :  { %1670 = vsyncadd [#allocation13], 4294967168 }
 0x280   :  { %1035 = vsyncpa [#allocation3], 1 }
 0x281   :  { %1036 = vsyncpa [#allocation6], 1 }
 0x282   :  { %1037 = vsyncpa [#allocation9], 1 }
 0x283   :  { %1038 = vsyncpa [#allocation4], 1 }
 0x284   :  { %1039 = vsyncpa [#allocation13], 1 }

</bundles_post_ra>
